<compile_context>
chip_gen: v7x
topology: tpu7x:2x2x1
jax: 0.10.0
libtpu: 0.0.40
codegen_flags: <defaults>
</compile_context>

<pallas_src>
import jax
import jax.numpy as jnp
from jax import lax
from jax.experimental import pallas as pl
from jax.experimental.pallas import tpu as pltpu

EPS = 1e-05


def _bn_kernel(x_ref, gamma_ref, beta_ref, o_ref):
    # x_ref / o_ref: (N, C, HW) NCHW view.   gamma_ref / beta_ref: (1, C) lane-dense rows.
    N, C, HW = x_ref.shape
    inv_n = jnp.float32(1.0 / (N * HW))
    ones_row = jnp.ones((1, HW), jnp.float32)

    # Flip each (C, HW) slab to lane-dense (HW, C) once (XLU transpose); N is tiny and static.
    xts = [x_ref[n].astype(jnp.float32).T for n in range(N)]          # each (HW, C)

    # Per-channel mean via MXU ones-vector matmul: ones(1,HW) @ (HW,C) -> (1,C).
    s = jnp.zeros((1, C), jnp.float32)
    for xt in xts:
        s = s + jnp.dot(ones_row, xt, preferred_element_type=jnp.float32)
    mean = s * inv_n                                                   # (1, C)

    # Biased batch variance, two-pass (avoids cancellation).  d dies here — not reused below.
    v = jnp.zeros((1, C), jnp.float32)
    for xt in xts:
        d = xt - mean                                                  # sublane-broadcast sub
        v = v + jnp.dot(ones_row, d * d, preferred_element_type=jnp.float32)
    var = v * inv_n                                                    # (1, C)

    # Fold everything into per-channel scale/shift (EUP rsqrt — free slot).
    gamma = gamma_ref[...].astype(jnp.float32)                         # (1, C)
    beta = beta_ref[...].astype(jnp.float32)                           # (1, C)
    scale = gamma * lax.rsqrt(var + EPS)                               # (1, C)
    shift = beta - mean * scale                                        # (1, C)

    # Single FMA per element on lane-dense vregs, then flip back for the NCHW store.
    for n in range(N):
        yt = xts[n] * scale + shift                                    # (HW, C)
        o_ref[n] = yt.T.astype(o_ref.dtype)                            # (C, HW)


def batchnorm2d_pallas(x_nchw, gamma, beta):
    """PyTorch BatchNorm2d(C) training-mode forward. x_nchw: (N, C, H, W); gamma, beta: (C,)."""
    N, C, H, W = x_nchw.shape
    HW = H * W
    # Pure reshapes (free views) only — no wrapper transposes / extra dispatches.
    x3d = x_nchw.reshape(N, C, HW)
    g2d = gamma.reshape(1, C)
    b2d = beta.reshape(1, C)

    y3d = pl.pallas_call(
        _bn_kernel,
        out_shape=jax.ShapeDtypeStruct((N, C, HW), x_nchw.dtype),
        in_specs=[
            pl.BlockSpec(memory_space=pltpu.MemorySpace.VMEM),
            pl.BlockSpec(memory_space=pltpu.MemorySpace.VMEM),
            pl.BlockSpec(memory_space=pltpu.MemorySpace.VMEM),
        ],
        out_specs=pl.BlockSpec(memory_space=pltpu.MemorySpace.VMEM),
    )(x3d, g2d, b2d)

    return y3d.reshape(N, C, H, W)


def _reference(x_nchw, gamma, beta):
    # Pure-JAX reference of PyTorch BatchNorm2d training-mode forward (biased batch variance).
    mean = jnp.mean(x_nchw, axis=(0, 2, 3), keepdims=True)
    var = jnp.mean((x_nchw - mean) ** 2, axis=(0, 2, 3), keepdims=True)
    g = gamma.reshape(1, -1, 1, 1)
    b = beta.reshape(1, -1, 1, 1)
    return (x_nchw - mean) * lax.rsqrt(var + EPS) * g + b


if __name__ == "__main__":
    key = jax.random.PRNGKey(0)
    k_x, k_g, k_b = jax.random.split(key, 3)

    N, C, H, W = 1, 512, 7, 7  # matches the module input torch.Size([1, 512, 7, 7])
    x = jax.random.normal(k_x, (N, C, H, W), dtype=jnp.float32)
    # Non-trivial affine params to exercise the scale/shift path
    # (PyTorch default init is weight=1, bias=0; forward semantics are identical).
    gamma = 1.0 + 0.1 * jax.random.normal(k_g, (C,), dtype=jnp.float32)
    beta = 0.1 * jax.random.normal(k_b, (C,), dtype=jnp.float32)

    out = jax.block_until_ready(batchnorm2d_pallas(x, gamma, beta))

    ref = _reference(x, gamma, beta)
    assert out.shape == (N, C, H, W)
    assert jnp.allclose(out, ref, atol=1e-4, rtol=1e-4), float(jnp.max(jnp.abs(out - ref)))

    print("KERNEL_OK")
</pallas_src>

<mosaic_0001>
module attributes {stable_mosaic.version = 11 : i64} {
  func.func @_bn_kernel(%arg0: memref<1x512x49xf32, #tpu.memory_space<vmem>>, %arg1: memref<1x512xf32, #tpu.memory_space<vmem>>, %arg2: memref<1x512xf32, #tpu.memory_space<vmem>>, %arg3: memref<1x512x49xf32, #tpu.memory_space<vmem>>) attributes {dimension_semantics = [], scalar_prefetch = 0 : i64, scratch_operands = 0 : i64, tpu.core_type = #tpu.core_type<tc>} {
    %cst = arith.constant 1.000000e+00 : f32
    %0 = vector.broadcast %cst : f32 to vector<1x49xf32>
    %c0 = arith.constant 0 : index
    %c0_0 = arith.constant 0 : index
    %c0_1 = arith.constant 0 : index
    %1 = vector.load %arg0[%c0, %c0_0, %c0_1] : memref<1x512x49xf32, #tpu.memory_space<vmem>>, vector<1x512x49xf32>
    %2 = vector.shape_cast %1 : vector<1x512x49xf32> to vector<512x49xf32>
    %3 = tpu.transpose %2, [1, 0] : vector<512x49xf32> -> vector<49x512xf32>
    %cst_2 = arith.constant 0.000000e+00 : f32
    %4 = vector.broadcast %cst_2 : f32 to vector<1x512xf32>
    %cst_3 = arith.constant dense<0.000000e+00> : vector<1x512xf32>
    %5 = tpu.matmul %0, %3, %cst_3 {dimension_numbers = #tpu.dot_dimension_numbers<[1], [0], [0], [1], [0, 0, 1, 1], [], []>} : vector<1x49xf32>, vector<49x512xf32>, vector<1x512xf32> -> vector<1x512xf32>
    %6 = arith.addf %4, %5 : vector<1x512xf32>
    %cst_4 = arith.constant 0.0204081628 : f32
    %7 = vector.broadcast %cst_4 : f32 to vector<1x512xf32>
    %8 = arith.mulf %6, %7 : vector<1x512xf32>
    %cst_5 = arith.constant 0.000000e+00 : f32
    %9 = vector.broadcast %cst_5 : f32 to vector<1x512xf32>
    %10 = vector.broadcast %8 : vector<1x512xf32> to vector<49x512xf32>
    %11 = arith.subf %3, %10 : vector<49x512xf32>
    %12 = arith.mulf %11, %11 : vector<49x512xf32>
    %cst_6 = arith.constant dense<0.000000e+00> : vector<1x512xf32>
    %13 = tpu.matmul %0, %12, %cst_6 {dimension_numbers = #tpu.dot_dimension_numbers<[1], [0], [0], [1], [0, 0, 1, 1], [], []>} : vector<1x49xf32>, vector<49x512xf32>, vector<1x512xf32> -> vector<1x512xf32>
    %14 = arith.addf %9, %13 : vector<1x512xf32>
    %cst_7 = arith.constant 0.0204081628 : f32
    %15 = vector.broadcast %cst_7 : f32 to vector<1x512xf32>
    %16 = arith.mulf %14, %15 : vector<1x512xf32>
    %c0_8 = arith.constant 0 : index
    %c0_9 = arith.constant 0 : index
    %17 = vector.load %arg1[%c0_8, %c0_9] : memref<1x512xf32, #tpu.memory_space<vmem>>, vector<1x512xf32>
    %c0_10 = arith.constant 0 : index
    %c0_11 = arith.constant 0 : index
    %18 = vector.load %arg2[%c0_10, %c0_11] : memref<1x512xf32, #tpu.memory_space<vmem>>, vector<1x512xf32>
    %cst_12 = arith.constant 9.99999974E-6 : f32
    %19 = vector.broadcast %cst_12 : f32 to vector<1x512xf32>
    %20 = arith.addf %16, %19 : vector<1x512xf32>
    %21 = math.rsqrt %20 : vector<1x512xf32>
    %22 = arith.mulf %17, %21 : vector<1x512xf32>
    %23 = arith.mulf %8, %22 : vector<1x512xf32>
    %24 = arith.subf %18, %23 : vector<1x512xf32>
    %25 = vector.broadcast %22 : vector<1x512xf32> to vector<49x512xf32>
    %26 = arith.mulf %3, %25 : vector<49x512xf32>
    %27 = vector.broadcast %24 : vector<1x512xf32> to vector<49x512xf32>
    %28 = arith.addf %26, %27 : vector<49x512xf32>
    %29 = tpu.transpose %28, [1, 0] : vector<49x512xf32> -> vector<512x49xf32>
    %c0_13 = arith.constant 0 : index
    %c0_14 = arith.constant 0 : index
    %c0_15 = arith.constant 0 : index
    %30 = vector.load %arg3[%c0_13, %c0_14, %c0_15] : memref<1x512x49xf32, #tpu.memory_space<vmem>>, vector<1x512x49xf32>
    %31 = vector.shape_cast %30 : vector<1x512x49xf32> to vector<512x49xf32>
    %32 = vector.shape_cast %29 : vector<512x49xf32> to vector<1x512x49xf32>
    tpu.vector_store %arg3[%c0_13, %c0_14, %c0_15], %32 {strides = array<i32>} : memref<1x512x49xf32, #tpu.memory_space<vmem>>, vector<1x512x49xf32>,
    return
  }
}

</mosaic_0001>

<bundles_post_ra>
// kernel: tpu_custom_call.1
= control target key start
LH: loop header
LB: loop body
LE: loop exit
PB: predicated region body
PF: predicated region fallthrough
CT: control target
= control target key end

     0   :  { %v1038_v48 = vmov 0.0   ;;  %vm210_vm0 = vcmask 1040384   ;;  %vm206_vm1 = vcmask 400384   ;;  %s1780_s0 = inlined_call_operand.vmem [shape: f32[1,512,49], index: 0, kind: input, shape index: {}]   ;;  %s1781_s1 = inlined_call_operand.vmem [shape: f32[1,512], index: 1, kind: input, shape index: {}]   ;;  %s1782_s2 = inlined_call_operand.vmem [shape: f32[1,512], index: 2, kind: input, shape index: {}]   ;;  %s1783_s3 = inlined_call_operand.vmem [shape: f32[1,512,49], index: 3, kind: output, shape index: {}]  }
   0x1   :  { %v62_v0 = vld [vmem:[%s1780_s0 + $0x180] sm:$0xff]  ;;  %v63_v2 = vld [vmem:[%s1780_s0 + $0x188] sm:$0xff]  ;;  %v64_v4 = vld [vmem:[%s1780_s0 + $0x190] sm:$0xff]  ;;  %287 = vmatprep.mubr.f32.mxu0 %v1038_v48  ;;  %358 = vmatprep.mubr.f32.mxu1 %v1038_v48 }
   0x2   :  { %v30_v1 = vld [vmem:[%s1780_s0 + $0x80] sm:$0xff]  ;;  %174 = vxpose.xlu1.b32.start [1/16] (narrow) %v62_v0, 56  ;;  %v31_v3 = vld [vmem:[%s1780_s0 + $0x88] sm:$0xff]  ;;  %v32_v5 = vld [vmem:[%s1780_s0 + $0x90] sm:$0xff] }
   0x3   :  { %110 = vxpose.xlu0.b32.start [1/16] (narrow) %v30_v1, 56  ;;  %v65_v6 = vld [vmem:[%s1780_s0 + $0x198] sm:$0xff]  ;;  %v66_v8 = vld [vmem:[%s1780_s0 + $0x1a0] sm:$0xff]  ;;  %v67_v10 = vld [vmem:[%s1780_s0 + $0x1a8] sm:$0xff] }
   0x4   :  { %v33_v7 = vld [vmem:[%s1780_s0 + $0x98] sm:$0xff]  ;;  %v34_v9 = vld [vmem:[%s1780_s0 + $0xa0] sm:$0xff]  ;;  %v35_v11 = vld [vmem:[%s1780_s0 + $0xa8] sm:$0xff] }
   0x5   :  { %v68_v12 = vld [vmem:[%s1780_s0 + $0x1b0] sm:$0xff]  ;;  %v69_v14 = vld [vmem:[%s1780_s0 + $0x1b8] sm:$0xff]  ;;  %v70_v16 = vld [vmem:[%s1780_s0 + $0x1c0] sm:$0xff] }
   0x6   :  { %175 = vxpose.xlu1.b32.cont [2/16] (narrow) %v63_v2, 56  ;;  %v36_v13 = vld [vmem:[%s1780_s0 + $0xb0] sm:$0xff]  ;;  %v37_v15 = vld [vmem:[%s1780_s0 + $0xb8] sm:$0xff]  ;;  %v38_v17 = vld [vmem:[%s1780_s0 + $0xc0] sm:$0xff] }
   0x7   :  { %111 = vxpose.xlu0.b32.cont [2/16] (narrow) %v31_v3, 56  ;;  %v71_v18 = vld [vmem:[%s1780_s0 + $0x1c8] sm:$0xff]  ;;  %v72_v20 = vld [vmem:[%s1780_s0 + $0x1d0] sm:$0xff]  ;;  %v73_v22 = vld [vmem:[%s1780_s0 + $0x1d8] sm:$0xff] }
   0x8   :  { %v39_v19 = vld [vmem:[%s1780_s0 + $0xc8] sm:$0xff]  ;;  %v40_v21 = vld [vmem:[%s1780_s0 + $0xd0] sm:$0xff]  ;;  %v41_v23 = vld [vmem:[%s1780_s0 + $0xd8] sm:$0xff] }
   0x9   :  { %v74_v24 = vld [vmem:[%s1780_s0 + $0x1e0] sm:$0xff]  ;;  %v75_v26 = vld [vmem:[%s1780_s0 + $0x1e8] sm:$0xff]  ;;  %v76_v28 = vld [vmem:[%s1780_s0 + $0x1f0] sm:$0xff] }
   0xa   :  { %176 = vxpose.xlu1.b32.cont [3/16] (narrow) %v64_v4, 56  ;;  %v42_v25 = vld [vmem:[%s1780_s0 + $0xe0] sm:$0xff]  ;;  %v43_v27 = vld [vmem:[%s1780_s0 + $0xe8] sm:$0xff]  ;;  %v44_v29 = vld [vmem:[%s1780_s0 + $0xf0] sm:$0xff] }
   0xb   :  { %112 = vxpose.xlu0.b32.cont [3/16] (narrow) %v32_v5, 56  ;;  %v77_v30 = vld [vmem:[%s1780_s0 + $0x1f8] sm:$0xff]  ;;  %v46_v32 = vld [vmem:[%s1780_s0 + $0x100] sm:$0xff]  ;;  %v47_v34 = vld [vmem:[%s1780_s0 + $0x108] sm:$0xff] }
   0xc   :  { %v45_v31 = vld [vmem:[%s1780_s0 + $0xf8] sm:$0xff]  ;;  %v14_v33 = vld [vmem:[%s1780_s0] sm:$0xff]  ;;  %v15_v35 = vld [vmem:[%s1780_s0 + $0x8] sm:$0xff] }
   0xd   :  { %v48_v36 = vld [vmem:[%s1780_s0 + $0x110] sm:$0xff]  ;;  %v49_v38 = vld [vmem:[%s1780_s0 + $0x118] sm:$0xff]  ;;  %v50_v40 = vld [vmem:[%s1780_s0 + $0x120] sm:$0xff] }
   0xe   :  { %177 = vxpose.xlu1.b32.cont [4/16] (narrow) %v65_v6, 56  ;;  %v16_v37 = vld [vmem:[%s1780_s0 + $0x10] sm:$0xff]  ;;  %v17_v39 = vld [vmem:[%s1780_s0 + $0x18] sm:$0xff]  ;;  %v18_v41 = vld [vmem:[%s1780_s0 + $0x20] sm:$0xff] }
   0xf   :  { %113 = vxpose.xlu0.b32.cont [4/16] (narrow) %v33_v7, 56  ;;  %v51_v42 = vld [vmem:[%s1780_s0 + $0x128] sm:$0xff]  ;;  %v52_v44 = vld [vmem:[%s1780_s0 + $0x130] sm:$0xff]  ;;  %v53_v46 = vld [vmem:[%s1780_s0 + $0x138] sm:$0xff] }
  0x10   :  { %v19_v43 = vld [vmem:[%s1780_s0 + $0x28] sm:$0xff]  ;;  %v20_v45 = vld [vmem:[%s1780_s0 + $0x30] sm:$0xff]  ;;  %v21_v47 = vld [vmem:[%s1780_s0 + $0x38] sm:$0xff] }
  0x11   :  { %v54_v49 = vld [vmem:[%s1780_s0 + $0x140] sm:$0xff]  ;;  %v55_v51 = vld [vmem:[%s1780_s0 + $0x148] sm:$0xff]  ;;  %v56_v53 = vld [vmem:[%s1780_s0 + $0x150] sm:$0xff] }
  0x12   :  { %178 = vxpose.xlu1.b32.cont [5/16] (narrow) %v66_v8, 56  ;;  %v22_v50 = vld [vmem:[%s1780_s0 + $0x40] sm:$0xff]  ;;  %v23_v52 = vld [vmem:[%s1780_s0 + $0x48] sm:$0xff]  ;;  %v24_v54 = vld [vmem:[%s1780_s0 + $0x50] sm:$0xff] }
  0x13   :  { %114 = vxpose.xlu0.b32.cont [5/16] (narrow) %v34_v9, 56  ;;  %v57_v55 = vld [vmem:[%s1780_s0 + $0x158] sm:$0xff]  ;;  %v58_v57 = vld [vmem:[%s1780_s0 + $0x160] sm:$0xff]  ;;  %v59_v59 = vld [vmem:[%s1780_s0 + $0x168] sm:$0xff] }
  0x14   :  { %v25_v56 = vld [vmem:[%s1780_s0 + $0x58] sm:$0xff]  ;;  %v26_v58 = vld [vmem:[%s1780_s0 + $0x60] sm:$0xff]  ;;  %v27_v60 = vld [vmem:[%s1780_s0 + $0x68] sm:$0xff] }
  0x15   :  { %v60_v61 = vld [vmem:[%s1780_s0 + $0x170] sm:$0xff]  ;;  %v61_v63 = vld [vmem:[%s1780_s0 + $0x178] sm:$0xff] }
  0x16   :  { %179 = vxpose.xlu1.b32.cont [6/16] (narrow) %v67_v10, 56  ;;  %v28_v62 = vld [vmem:[%s1780_s0 + $0x70] sm:$0xff]  ;;  %v29_v0 = vld [vmem:[%s1780_s0 + $0x78] sm:$0xff] }
  0x17   :  { %115 = vxpose.xlu0.b32.cont [6/16] (narrow) %v35_v11, 56 }
  0x1a   :  { %180 = vxpose.xlu1.b32.cont [7/16] (narrow) %v68_v12, 56 }
  0x1b   :  { %116 = vxpose.xlu0.b32.cont [7/16] (narrow) %v36_v13, 56 }
  0x1e   :  { %181 = vxpose.xlu1.b32.cont [8/16] (narrow) %v69_v14, 56 }
  0x1f   :  { %117 = vxpose.xlu0.b32.cont [8/16] (narrow) %v37_v15, 56 }
  0x22   :  { %182 = vxpose.xlu1.b32.cont [9/16] (narrow) %v70_v16, 56 }
  0x23   :  { %118 = vxpose.xlu0.b32.cont [9/16] (narrow) %v38_v17, 56 }
  0x26   :  { %183 = vxpose.xlu1.b32.cont [10/16] (narrow) %v71_v18, 56 }
  0x27   :  { %119 = vxpose.xlu0.b32.cont [10/16] (narrow) %v39_v19, 56 }
  0x2a   :  { %184 = vxpose.xlu1.b32.cont [11/16] (narrow) %v72_v20, 56 }
  0x2b   :  { %120 = vxpose.xlu0.b32.cont [11/16] (narrow) %v40_v21, 56 }
  0x2e   :  { %185 = vxpose.xlu1.b32.cont [12/16] (narrow) %v73_v22, 56 }
  0x2f   :  { %121 = vxpose.xlu0.b32.cont [12/16] (narrow) %v41_v23, 56 }
  0x32   :  { %186 = vxpose.xlu1.b32.cont [13/16] (narrow) %v74_v24, 56 }
  0x33   :  { %122 = vxpose.xlu0.b32.cont [13/16] (narrow) %v42_v25, 56 }
  0x36   :  { %187 = vxpose.xlu1.b32.cont [14/16] (narrow) %v75_v26, 56 }
  0x37   :  { %123 = vxpose.xlu0.b32.cont [14/16] (narrow) %v43_v27, 56 }
  0x3a   :  { %188 = vxpose.xlu1.b32.cont [15/16] (narrow) %v76_v28, 56 }
  0x3b   :  { %124 = vxpose.xlu0.b32.cont [15/16] (narrow) %v44_v29, 56 }
  0x3e   :  { %189 = vxpose.xlu1.b32.end [16/16] (narrow) %v77_v30, 56 }
  0x3f   :  { %125 = vxpose.xlu0.b32.end [16/16] (narrow) %v45_v31, 56 }
  0x42   :  { %142 = vxpose.xlu1.b32.start [1/16] (narrow) %v46_v32, 56 }
  0x43   :  { %78 = vxpose.xlu0.b32.start [1/16] (narrow) %v14_v33, 56 }
  0x46   :  { %143 = vxpose.xlu1.b32.cont [2/16] (narrow) %v47_v34, 56 }
  0x47   :  { %79 = vxpose.xlu0.b32.cont [2/16] (narrow) %v15_v35, 56 }
  0x4a   :  { %144 = vxpose.xlu1.b32.cont [3/16] (narrow) %v48_v36, 56 }
  0x4b   :  { %80 = vxpose.xlu0.b32.cont [3/16] (narrow) %v16_v37, 56 }
  0x4e   :  { %145 = vxpose.xlu1.b32.cont [4/16] (narrow) %v49_v38, 56 }
  0x4f   :  { %81 = vxpose.xlu0.b32.cont [4/16] (narrow) %v17_v39, 56 }
  0x52   :  { %146 = vxpose.xlu1.b32.cont [5/16] (narrow) %v50_v40, 56 }
  0x53   :  { %82 = vxpose.xlu0.b32.cont [5/16] (narrow) %v18_v41, 56  ;;  %v1039_v41 = vmov 1.0  }
  0x56   :  { %147 = vxpose.xlu1.b32.cont [6/16] (narrow) %v51_v42, 56  ;;  %v369_v42 = vlaneseq }
  0x57   :  { %83 = vxpose.xlu0.b32.cont [6/16] (narrow) %v19_v43, 56 }
  0x58   :  { %v1349_v43 = vshrl.u32 %v369_v42, 7 }
  0x5a   :  { %148 = vxpose.xlu1.b32.cont [7/16] (narrow) %v52_v44, 56  ;;  %v1352_v44 = vsub.s32 0, %v1349_v43 }
  0x5b   :  { %84 = vxpose.xlu0.b32.cont [7/16] (narrow) %v20_v45, 56 }
  0x5e   :  { %149 = vxpose.xlu1.b32.cont [8/16] (narrow) %v53_v46, 56 }
  0x5f   :  { %85 = vxpose.xlu0.b32.cont [8/16] (narrow) %v21_v47, 56 }
  0x62   :  { %150 = vxpose.xlu1.b32.cont [9/16] (narrow) %v54_v49, 56 }
  0x63   :  { %86 = vxpose.xlu0.b32.cont [9/16] (narrow) %v22_v50, 56 }
  0x66   :  { %151 = vxpose.xlu1.b32.cont [10/16] (narrow) %v55_v51, 56 }
  0x67   :  { %87 = vxpose.xlu0.b32.cont [10/16] (narrow) %v23_v52, 56 }
  0x6a   :  { %152 = vxpose.xlu1.b32.cont [11/16] (narrow) %v56_v53, 56 }
  0x6b   :  { %88 = vxpose.xlu0.b32.cont [11/16] (narrow) %v24_v54, 56 }
  0x6e   :  { %153 = vxpose.xlu1.b32.cont [12/16] (narrow) %v57_v55, 56 }
  0x6f   :  { %89 = vxpose.xlu0.b32.cont [12/16] (narrow) %v25_v56, 56 }
  0x72   :  { %154 = vxpose.xlu1.b32.cont [13/16] (narrow) %v58_v57, 56 }
  0x73   :  { %90 = vxpose.xlu0.b32.cont [13/16] (narrow) %v26_v58, 56 }
  0x76   :  { %155 = vxpose.xlu1.b32.cont [14/16] (narrow) %v59_v59, 56 }
  0x77   :  { %91 = vxpose.xlu0.b32.cont [14/16] (narrow) %v27_v60, 56 }
  0x7a   :  { %156 = vxpose.xlu1.b32.cont [15/16] (narrow) %v60_v61, 56 }
  0x7b   :  { %92 = vxpose.xlu0.b32.cont [15/16] (narrow) %v28_v62, 56 }
  0x7e   :  { %157 = vxpose.xlu1.b32.end [16/16] (narrow) %v61_v63, 56 }
  0x7f   :  { %93 = vxpose.xlu0.b32.end [16/16] (narrow) %v29_v0, 56 }
  0x82   :  { %v1255_v1 = vpop.trf.xlu1 }
  0x83   :  { %v1257_v2 = vpop.trf.xlu0 }
  0x86   :  { %v1259_v3 = vpop.trf.xlu1 }
  0x87   :  { %v1261_v4 = vpop.trf.xlu0  ;;  %v991_v6 = vpack.c.bf16 %v1259_v3, %v1255_v1 }
  0x88   :  { %v979_v5 = vpack.c.bf16 %v1261_v4, %v1257_v2 }
  0x89   :  { %992 = vmatprep.subr.bf16.mxu1 %v991_v6 }
  0x8a   :  { %980 = vmatprep.subr.bf16.mxu0 %v979_v5  ;;  %v1267_v7 = vpop.trf.xlu1 }
  0x8b   :  { %v1269_v8 = vpop.trf.xlu0 }
  0x8e   :  { %v1271_v9 = vpop.trf.xlu1 }
  0x8f   :  { %v1273_v10 = vpop.trf.xlu0  ;;  %v995_v23 = vpack.c.bf16 %v1271_v9, %v1267_v7 }
  0x90   :  { %v983_v24 = vpack.c.bf16 %v1273_v10, %v1269_v8 }
  0x92   :  { %v1275_v11 = vpop.trf.xlu1 }
  0x93   :  { %v1277_v12 = vpop.trf.xlu0 }
  0x96   :  { %v1279_v13 = vpop.trf.xlu1 }
  0x97   :  { %v1281_v14 = vpop.trf.xlu0  ;;  %v999_v31 = vpack.c.bf16 %v1279_v13, %v1275_v11 }
  0x98   :  { %v987_v32 = vpack.c.bf16 %v1281_v14, %v1277_v12 }
  0x9a   :  { %v1283_v15 = vpop.trf.xlu1 }
  0x9b   :  { %v1285_v16 = vpop.trf.xlu0 }
  0xc2   :  { %v1287_v17 = vpop.trf.xlu1 }
  0xc3   :  { %v1289_v18 = vpop.trf.xlu0 }
  0xc6   :  { %v1291_v19 = vpop.trf.xlu1 }
  0xc7   :  { %v1293_v20 = vpop.trf.xlu0  ;;  %v993_v22 = vpack.c.bf16 %v1291_v19, %v1287_v17 }
  0xc8   :  { %v981_v21 = vpack.c.bf16 %v1293_v20, %v1289_v18 }
  0xc9   :  { %994 = vmatpush1.bf16.msra.mxu1 %v993_v22 }
  0xca   :  { %982 = vmatpush1.bf16.msra.mxu0 %v981_v21  ;;  %996 = vmatprep.subr.bf16.mxu1 %v995_v23  ;;  %v1303_v25 = vpop.trf.xlu1 }
  0xcb   :  { %984 = vmatprep.subr.bf16.mxu0 %v983_v24  ;;  %v1305_v26 = vpop.trf.xlu0 }
  0xce   :  { %v1307_v27 = vpop.trf.xlu1 }
  0xcf   :  { %v1309_v28 = vpop.trf.xlu0  ;;  %v997_v29 = vpack.c.bf16 %v1307_v27, %v1303_v25 }
  0xd0   :  { %v985_v30 = vpack.c.bf16 %v1309_v28, %v1305_v26 }
  0xd1   :  { %998 = vmatpush1.bf16.msra.mxu1 %v997_v29 }
  0xd2   :  { %986 = vmatpush1.bf16.msra.mxu0 %v985_v30  ;;  %1000 = vmatprep.subr.bf16.mxu1 %v999_v31  ;;  %v1319_v33 = vpop.trf.xlu1 }
  0xd3   :  { %988 = vmatprep.subr.bf16.mxu0 %v987_v32  ;;  %v1321_v34 = vpop.trf.xlu0 }
  0xd6   :  { %v1323_v35 = vpop.trf.xlu1 }
  0xd7   :  { %v1325_v36 = vpop.trf.xlu0  ;;  %v1001_v37 = vpack.c.bf16 %v1323_v35, %v1319_v33 }
  0xd8   :  { %v989_v38 = vpack.c.bf16 %v1325_v36, %v1321_v34 }
  0xd9   :  { %1002 = vmatpush1.bf16.msra.mxu1 %v1001_v37 }
  0xda   :  { %990 = vmatpush1.bf16.msra.mxu0 %v989_v38  ;;  %970 = vmatprep.subr.msk.mxu1 %vm210_vm0, %v1283_v15  ;;  %v1335_v39 = vpop.trf.xlu1 }
  0xdb   :  { %967 = vmatprep.subr.msk.mxu0 %vm210_vm0, %v1285_v16  ;;  %v1337_v40 = vpop.trf.xlu0 }
  0xdd   :  { %971 = vmatpush1.msk.msra.mxu1 %vm210_vm0, %v1335_v39 }
  0xde   :  { %968 = vmatpush1.msk.msra.mxu0 %vm210_vm0, %v1337_v40  ;;  %972 = vmatmul.mubr.msk.f32.vlgmr.msra.gmra.mrb[0].mxu1 %vm206_vm1, %v1039_v41 }
  0xdf   :  { %969 = vmatmul.mubr.msk.f32.vlgmr.msra.gmra.mrb[0].mxu0 %vm206_vm1, %v1039_v41  ;;  %588 = vmatprep.mubr.f32.mxu1 %v1038_v48 }
  0xe0   :  { %517 = vmatprep.mubr.f32.mxu0 %v1038_v48 }
 0x1b1   :  { %v360_v46 = vpop.f32.mrb[0].mxu1 }
 0x1b2   :  { %v289_v45 = vpop.f32.mrb[0].mxu0  ;;  %v1356_v49 = vmul.f32 0.020408163, %v360_v46  ;;  %v362_v51 = vpop.f32.mrb[1].mxu1 }
 0x1b3   :  { %v1354_v47 = vmul.f32 0.020408163, %v289_v45  ;;  %v291_v50 = vpop.f32.mrb[1].mxu0  ;;  %v1360_v53 = vmul.f32 0.020408163, %v362_v51 }
 0x1b4   :  { %v1358_v52 = vmul.f32 0.020408163, %v291_v50  ;;  %v1368_v54 = vrot.slane %v1356_v49, %v1352_v44 }
 0x1b5   :  { %v1364_v48 = vrot.slane %v1354_v47, %v1352_v44  ;;  %v1376_v56 = vrot.slane %v1360_v53, %v1352_v44 }
 0x1b6   :  { %v1372_v55 = vrot.slane %v1358_v52, %v1352_v44  ;;  %v387_v59 = vsub.f32 %v1287_v17, %v1368_v54  ;;  %v391_v60 = vsub.f32 %v1291_v19, %v1368_v54 }
 0x1b7   :  { %v385_v57 = vsub.f32 %v1289_v18, %v1364_v48  ;;  %v389_v58 = vsub.f32 %v1293_v20, %v1364_v48  ;;  %v388_v63 = vsub.f32 %v1255_v1, %v1376_v56  ;;  %v392_v0 = vsub.f32 %v1259_v3, %v1376_v56 }
 0x1b8   :  { %v386_v61 = vsub.f32 %v1257_v2, %v1372_v55  ;;  %v390_v62 = vsub.f32 %v1261_v4, %v1372_v55  ;;  %v415_v21 = vmul.f32 %v387_v59, %v387_v59  ;;  %v419_v22 = vmul.f32 %v391_v60, %v391_v60 }
 0x1b9   :  { %v413_v5 = vmul.f32 %v385_v57, %v385_v57  ;;  %v417_v6 = vmul.f32 %v389_v58, %v389_v58  ;;  %v416_v29 = vmul.f32 %v388_v63, %v388_v63  ;;  %v420_v30 = vmul.f32 %v392_v0, %v392_v0 }
 0x1ba   :  { %v414_v23 = vmul.f32 %v386_v61, %v386_v61  ;;  %v418_v24 = vmul.f32 %v390_v62, %v390_v62  ;;  %v1017_v32 = vpack.c.bf16 %v419_v22, %v415_v21  ;;  %v394_v37 = vsub.f32 %v1269_v8, %v1372_v55 }
 0x1bb   :  { %v1005_v31 = vpack.c.bf16 %v417_v6, %v413_v5  ;;  %v398_v38 = vsub.f32 %v1273_v10, %v1372_v55  ;;  %v1015_v45 = vpack.c.bf16 %v420_v30, %v416_v29  ;;  %v396_v46 = vsub.f32 %v1267_v7, %v1376_v56 }
 0x1bc   :  { %v1003_v42 = vpack.c.bf16 %v418_v24, %v414_v23  ;;  %v400_v50 = vsub.f32 %v1271_v9, %v1376_v56  ;;  %v422_v51 = vmul.f32 %v394_v37, %v394_v37  ;;  %v393_v58 = vsub.f32 %v1305_v26, %v1364_v48 }
 0x1bd   :  { %v426_v57 = vmul.f32 %v398_v38, %v398_v38  ;;  %v397_v59 = vsub.f32 %v1309_v28, %v1364_v48  ;;  %1016 = vmatprep.subr.bf16.mxu1 %v1015_v45  ;;  %v424_v60 = vmul.f32 %v396_v46, %v396_v46  ;;  %v395_v62 = vsub.f32 %v1303_v25, %v1368_v54 }
 0x1be   :  { %1004 = vmatprep.subr.bf16.mxu0 %v1003_v42  ;;  %v428_v61 = vmul.f32 %v400_v50, %v400_v50  ;;  %1018 = vmatpush1.bf16.msra.mxu1 %v1017_v32  ;;  %v421_v0 = vmul.f32 %v393_v58, %v393_v58  ;;  %v399_v21 = vsub.f32 %v1307_v27, %v1368_v54 }
 0x1bf   :  { %1006 = vmatpush1.bf16.msra.mxu0 %v1005_v31  ;;  %v1007_v63 = vpack.c.bf16 %v426_v57, %v422_v51  ;;  %v425_v5 = vmul.f32 %v397_v59, %v397_v59  ;;  %v423_v22 = vmul.f32 %v395_v62, %v395_v62  ;;  %v402_v23 = vsub.f32 %v1277_v12, %v1372_v55 }
 0x1c0   :  { %v1019_v6 = vpack.c.bf16 %v428_v61, %v424_v60  ;;  %v406_v29 = vsub.f32 %v1281_v14, %v1372_v55  ;;  %v404_v30 = vsub.f32 %v1275_v11, %v1376_v56  ;;  %v408_v31 = vsub.f32 %v1279_v13, %v1376_v56 }
 0x1c1   :  { %1008 = vmatprep.subr.bf16.mxu0 %v1007_v63  ;;  %v1009_v24 = vpack.c.bf16 %v425_v5, %v421_v0  ;;  %v427_v32 = vmul.f32 %v399_v21, %v399_v21  ;;  %v430_v37 = vmul.f32 %v402_v23, %v402_v23  ;;  %v401_v38 = vsub.f32 %v1321_v34, %v1364_v48 }
 0x1c2   :  { %1020 = vmatprep.subr.bf16.mxu1 %v1019_v6  ;;  %v405_v42 = vsub.f32 %v1325_v36, %v1364_v48  ;;  %v434_v45 = vmul.f32 %v406_v29, %v406_v29  ;;  %v432_v46 = vmul.f32 %v404_v30, %v404_v30  ;;  %v436_v50 = vmul.f32 %v408_v31, %v408_v31 }
 0x1c3   :  { %1010 = vmatpush1.bf16.msra.mxu0 %v1009_v24  ;;  %v403_v51 = vsub.f32 %v1319_v33, %v1368_v54  ;;  %v1021_v57 = vpack.c.bf16 %v427_v32, %v423_v22  ;;  %v429_v58 = vmul.f32 %v401_v38, %v401_v38  ;;  %v407_v60 = vsub.f32 %v1323_v35, %v1368_v54 }
 0x1c4   :  { %v433_v59 = vmul.f32 %v405_v42, %v405_v42  ;;  %v1011_v61 = vpack.c.bf16 %v434_v45, %v430_v37  ;;  %v1023_v62 = vpack.c.bf16 %v436_v50, %v432_v46  ;;  %v410_v0 = vsub.f32 %v1285_v16, %v1372_v55 }
 0x1c5   :  { %v431_v63 = vmul.f32 %v403_v51, %v403_v51  ;;  %1022 = vmatpush1.bf16.msra.mxu1 %v1021_v57  ;;  %v435_v6 = vmul.f32 %v407_v60, %v407_v60  ;;  %v412_v21 = vsub.f32 %v1283_v15, %v1376_v56  ;;  %v409_v22 = vsub.f32 %v1337_v40, %v1364_v48 }
 0x1c6   :  { %v1013_v5 = vpack.c.bf16 %v433_v59, %v429_v58  ;;  %1012 = vmatprep.subr.bf16.mxu0 %v1011_v61  ;;  %1024 = vmatprep.subr.bf16.mxu1 %v1023_v62  ;;  %v438_v23 = vmul.f32 %v410_v0, %v410_v0  ;;  %v411_v29 = vsub.f32 %v1335_v39, %v1368_v54  ;;  %v1040_v58 = vmov 1966171168  }
 0x1c7   :  { %v1025_v24 = vpack.c.bf16 %v435_v6, %v431_v63  ;;  %v440_v55 = vmul.f32 %v412_v21, %v412_v21  ;;  %v437_v30 = vmul.f32 %v409_v22, %v409_v22  ;;  %v616_v59 = vunpack.c.l.s4 %v1040_v58 }
 0x1c8   :  { %1014 = vmatpush1.bf16.msra.mxu0 %v1013_v5  ;;  %v439_v56 = vmul.f32 %v411_v29, %v411_v29 }
 0x1c9   :  { %973 = vmatprep.subr.msk.mxu0 %vm210_vm0, %v438_v23  ;;  %1026 = vmatpush1.bf16.msra.mxu1 %v1025_v24  ;;  %v617_v60 = vunpack.c.0.s8 %v616_v59  ;;  %v599_v24 = vld [vmem:[%s1781_s1] sm:$0xf] }
 0x1ca   :  { %976 = vmatprep.subr.msk.mxu1 %vm210_vm0, %v440_v55  ;;  %v646_v55 = vsub.s32 1, %v1349_v43  ;;  %v600_v59 = vld [vmem:[%s1782_s2] sm:$0xf] }
 0x1cb   :  { %v620_v61 = vsub.s32 %v617_v60, %v1349_v43 }
 0x1cc   :  { %974 = vmatpush1.msk.msra.mxu0 %vm210_vm0, %v437_v30  ;;  %v650_v30 = vsub.s32 2, %v1349_v43 }
 0x1cd   :  { %975 = vmatmul.mubr.msk.f32.vlgmr.msra.gmra.mrb[2].mxu0 %vm206_vm1, %v1039_v41  ;;  %977 = vmatpush1.msk.msra.mxu1 %vm210_vm0, %v439_v56  ;;  %v654_v56 = vsub.s32 3, %v1349_v43 }
 0x1ce   :  { %978 = vmatmul.mubr.msk.f32.vlgmr.msra.gmra.mrb[2].mxu1 %vm206_vm1, %v1039_v41 }
 0x2a0   :  { %v519_v48 = vpop.f32.mrb[2].mxu0 }
 0x2a1   :  { %v595_v54 = vmul.f32 0.020408163, %v519_v48  ;;  %v521_v31 = vpop.f32.mrb[3].mxu0  ;;  %v590_v32 = vpop.f32.mrb[2].mxu1 }
 0x2a2   :  { %v596_v37 = vmul.f32 0.020408163, %v521_v31  ;;  %v597_v42 = vmul.f32 0.020408163, %v590_v32  ;;  %v592_v45 = vpop.f32.mrb[3].mxu1 }
 0x2a3   :  { %v601_v38 = vadd.f32 1e-05, %v595_v54  ;;  %v598_v50 = vmul.f32 0.020408163, %v592_v45 }
 0x2a4   :  { %v602_v46 = vadd.f32 1e-05, %v596_v37  ;;  %v603_v51 = vadd.f32 1e-05, %v597_v42 }
 0x2a5   :  { %1030 = vrsqrt.f32 %v601_v38  ;;  %v604_v57 = vadd.f32 1e-05, %v598_v50 }
 0x2a6   :  { %1032 = vrsqrt.f32 %v602_v46 }
 0x2a7   :  { %1034 = vrsqrt.f32 %v603_v51 }
 0x2a8   :  { %1036 = vrsqrt.f32 %v604_v57 }
 0x2af   :  { %v1031_v41 = vpop.eup %1030 }
 0x2b0   :  { %v1033_v62 = vpop.eup %1032 }
 0x2b1   :  { %v1035_v63 = vpop.eup %1034  ;;  %v613_v0 = vcombine.low %v1031_v41, %v1033_v62 }
 0x2b2   :  { %v1037_v5 = vpop.eup %1036 }
 0x2b3   :  { %v621_v6 = vrot.slane %v613_v0, %v620_v61  ;;  %v614_v21 = vcombine.low %v1035_v63, %v1037_v5 }
 0x2b5   :  { %v628_v22 = vrot.slane %v614_v21, %v620_v61 }
 0x2b7   :  { %v629_v23 = vcombine.low %v621_v6, %v628_v22 }
 0x2b9   :  { %v636_v29 = vrot.slane %v629_v23, %v620_v61 }
 0x2bb   :  { %v638_v48 = vmul.f32 %v636_v29, %v599_v24 }
 0x2bd   :  { %v1450_v54 = vrot.slane %v638_v48, %v1352_v44  ;;  %v1452_v31 = vrot.slane %v638_v48, %v646_v55  ;;  %v651_v32 = vrot.slane %v638_v48, %v650_v30  ;;  %v655_v37 = vrot.slane %v638_v48, %v654_v56 }
 0x2bf   :  { %v660_v38 = vmul.f32 %v1450_v54, %v1354_v47  ;;  %v661_v42 = vmul.f32 %v1452_v31, %v1358_v52  ;;  %v662_v45 = vmul.f32 %v651_v32, %v1356_v49  ;;  %v663_v46 = vmul.f32 %v655_v37, %v1360_v53 }
 0x2c0   :  { %v695_v47 = vmul.f32 %v1452_v31, %v1257_v2  ;;  %v694_v52 = vmul.f32 %v1450_v54, %v1289_v18  ;;  %v699_v49 = vmul.f32 %v1452_v31, %v1261_v4  ;;  %v698_v53 = vmul.f32 %v1450_v54, %v1293_v20 }
 0x2c1   :  { %v668_v50 = vcombine.low %v660_v38, %v661_v42  ;;  %v669_v43 = vcombine.low %v662_v45, %v663_v46  ;;  %v703_v62 = vmul.f32 %v1452_v31, %v1269_v8  ;;  %v702_v63 = vmul.f32 %v1450_v54, %v1305_v26 }
 0x2c2   :  { %v697_v18 = vmul.f32 %v655_v37, %v1255_v1  ;;  %v696_v4 = vmul.f32 %v651_v32, %v1287_v17  ;;  %v701_v6 = vmul.f32 %v655_v37, %v1259_v3  ;;  %v700_v20 = vmul.f32 %v651_v32, %v1291_v19 }
 0x2c3   :  { %v676_v51 = vrot.slane %v668_v50, %v620_v61  ;;  %v683_v57 = vrot.slane %v669_v43, %v620_v61  ;;  %v705_v26 = vmul.f32 %v655_v37, %v1267_v7  ;;  %v704_v22 = vmul.f32 %v651_v32, %v1303_v25 }
 0x2c4   :  { %v708_v23 = vmul.f32 %v651_v32, %v1307_v27  ;;  %v713_v1 = vmul.f32 %v655_v37, %v1275_v11  ;;  %v712_v17 = vmul.f32 %v651_v32, %v1319_v33  ;;  %v717_v3 = vmul.f32 %v655_v37, %v1279_v13 }
 0x2c5   :  { %v684_v58 = vcombine.low %v676_v51, %v683_v57  ;;  %v716_v19 = vmul.f32 %v651_v32, %v1323_v35  ;;  %v721_v24 = vmul.f32 %v655_v37, %v1283_v15  ;;  %v711_v51 = vmul.f32 %v1452_v31, %v1277_v12 }
 0x2c6   :  { %v710_v57 = vmul.f32 %v1450_v54, %v1321_v34  ;;  %v719_v12 = vmul.f32 %v1452_v31, %v1285_v16  ;;  %v718_v34 = vmul.f32 %v1450_v54, %v1337_v40 }
 0x2c7   :  { %v691_v60 = vrot.slane %v684_v58, %v620_v61 }
 0x2c9   :  { %v693_v41 = vsub.f32 %v600_v59, %v691_v60 }
 0x2cb   :  { %v1475_v61 = vrot.slane %v693_v41, %v646_v55  ;;  %v1478_v0 = vrot.slane %v693_v41, %v1352_v44  ;;  %v738_v2 = vrot.slane %v693_v41, %v654_v56  ;;  %v734_v5 = vrot.slane %v693_v41, %v650_v30 }
 0x2cc   :  { %v709_v44 = vmul.f32 %v655_v37, %v1271_v9  ;;  %v720_v9 = vmul.f32 %v651_v32, %v1335_v39  ;;  %v707_v39 = vmul.f32 %v1452_v31, %v1273_v10  ;;  %v706_v32 = vmul.f32 %v1450_v54, %v1309_v28 }
 0x2cd   :  { %v744_v8 = vadd.f32 %v1475_v61, %v695_v47  ;;  %v743_v21 = vadd.f32 %v1478_v0, %v694_v52  ;;  %v748_v7 = vadd.f32 %v1475_v61, %v699_v49  ;;  %v747_v25 = vadd.f32 %v1478_v0, %v698_v53 }
 0x2ce   :  { %v746_v29 = vadd.f32 %v738_v2, %v697_v18  ;;  %v745_v27 = vadd.f32 %v734_v5, %v696_v4  ;;  %v750_v55 = vadd.f32 %v738_v2, %v701_v6  ;;  %v749_v11 = vadd.f32 %v734_v5, %v700_v20 }
 0x2cf   :  { %803 = vxpose.xlu1.b32.start [1/7] (short) %v744_v8, 128  ;;  %771 = vxpose.xlu0.b32.start [1/7] (short) %v743_v21, 128  ;;  %v754_v30 = vadd.f32 %v738_v2, %v705_v26  ;;  %v753_v33 = vadd.f32 %v734_v5, %v704_v22  ;;  %v758_v56 = vadd.f32 %v738_v2, %v709_v44 }
 0x2d0   :  { %v757_v48 = vadd.f32 %v734_v5, %v708_v23  ;;  %v762_v38 = vadd.f32 %v738_v2, %v713_v1  ;;  %v761_v13 = vadd.f32 %v734_v5, %v712_v17  ;;  %v766_v35 = vadd.f32 %v738_v2, %v717_v3 }
 0x2d1   :  { %v765_v15 = vadd.f32 %v734_v5, %v716_v19  ;;  %v770_v37 = vadd.f32 %v738_v2, %v721_v24  ;;  %v769_v42 = vadd.f32 %v734_v5, %v720_v9  ;;  %v752_v45 = vadd.f32 %v1475_v61, %v703_v62 }
 0x2d2   :  { %v751_v46 = vadd.f32 %v1478_v0, %v702_v63  ;;  %v756_v50 = vadd.f32 %v1475_v61, %v707_v39  ;;  %v755_v43 = vadd.f32 %v1478_v0, %v706_v32  ;;  %v760_v58 = vadd.f32 %v1475_v61, %v711_v51 }
 0x2d3   :  { %804 = vxpose.xlu1.b32.cont [2/7] (short) %v748_v7, 128  ;;  %772 = vxpose.xlu0.b32.cont [2/7] (short) %v747_v25, 128  ;;  %v759_v59 = vadd.f32 %v1478_v0, %v710_v57  ;;  %v715_v10 = vmul.f32 %v1452_v31, %v1281_v14  ;;  %v714_v28 = vmul.f32 %v1450_v54, %v1325_v36 }
 0x2d4   :  { %v768_v47 = vadd.f32 %v1475_v61, %v719_v12  ;;  %v767_v52 = vadd.f32 %v1478_v0, %v718_v34 }
 0x2d5   :  { %v764_v60 = vadd.f32 %v1475_v61, %v715_v10  ;;  %v763_v41 = vadd.f32 %v1478_v0, %v714_v28 }
 0x2d7   :  { %805 = vxpose.xlu1.b32.cont [3/7] (short) %v752_v45, 128  ;;  %773 = vxpose.xlu0.b32.cont [3/7] (short) %v751_v46, 128 }
 0x2db   :  { %806 = vxpose.xlu1.b32.cont [4/7] (short) %v756_v50, 128  ;;  %774 = vxpose.xlu0.b32.cont [4/7] (short) %v755_v43, 128 }
 0x2df   :  { %807 = vxpose.xlu1.b32.cont [5/7] (short) %v760_v58, 128  ;;  %775 = vxpose.xlu0.b32.cont [5/7] (short) %v759_v59, 128 }
 0x2e3   :  { %808 = vxpose.xlu1.b32.cont [6/7] (short) %v764_v60, 128  ;;  %776 = vxpose.xlu0.b32.cont [6/7] (short) %v763_v41, 128 }
 0x2e7   :  { %809 = vxpose.xlu1.b32.end [7/7] (short) %v768_v47, 128  ;;  %777 = vxpose.xlu0.b32.end [7/7] (short) %v767_v52, 128 }
 0x30c   :  { %867 = vxpose.xlu1.b32.start [1/7] (short) %v746_v29, 128  ;;  %835 = vxpose.xlu0.b32.start [1/7] (short) %v745_v27, 128 }
 0x310   :  { %868 = vxpose.xlu1.b32.cont [2/7] (short) %v750_v55, 128  ;;  %836 = vxpose.xlu0.b32.cont [2/7] (short) %v749_v11, 128 }
 0x314   :  { %869 = vxpose.xlu1.b32.cont [3/7] (short) %v754_v30, 128  ;;  %837 = vxpose.xlu0.b32.cont [3/7] (short) %v753_v33, 128 }
 0x318   :  { %870 = vxpose.xlu1.b32.cont [4/7] (short) %v758_v56, 128  ;;  %838 = vxpose.xlu0.b32.cont [4/7] (short) %v757_v48, 128 }
 0x31c   :  { %871 = vxpose.xlu1.b32.cont [5/7] (short) %v762_v38, 128  ;;  %839 = vxpose.xlu0.b32.cont [5/7] (short) %v761_v13, 128 }
 0x320   :  { %872 = vxpose.xlu1.b32.cont [6/7] (short) %v766_v35, 128  ;;  %840 = vxpose.xlu0.b32.cont [6/7] (short) %v765_v15, 128 }
 0x324   :  { %873 = vxpose.xlu1.b32.end [7/7] (short) %v770_v37, 128  ;;  %841 = vxpose.xlu0.b32.end [7/7] (short) %v769_v42, 128 }
 0x34f   :  { %v819_v14 = vpop.trf.xlu1  ;;  %v787_v16 = vpop.trf.xlu0 }
 0x350   :  { %915 = vst.msk [vmem:[%s1783_s3 + $0x80] sm:$0xff] %vm206_vm1, %v819_v14  ;;  %899 = vst.msk [vmem:[%s1783_s3] sm:$0xff] %vm206_vm1, %v787_v16 }
 0x353   :  { %v820_v36 = vpop.trf.xlu1  ;;  %v788_v40 = vpop.trf.xlu0 }
 0x354   :  { %916 = vst.msk [vmem:[%s1783_s3 + $0x88] sm:$0xff] %vm206_vm1, %v820_v36  ;;  %900 = vst.msk [vmem:[%s1783_s3 + $0x8] sm:$0xff] %vm206_vm1, %v788_v40 }
 0x357   :  { %v821_v54 = vpop.trf.xlu1  ;;  %v789_v31 = vpop.trf.xlu0 }
 0x358   :  { %917 = vst.msk [vmem:[%s1783_s3 + $0x90] sm:$0xff] %vm206_vm1, %v821_v54  ;;  %901 = vst.msk [vmem:[%s1783_s3 + $0x10] sm:$0xff] %vm206_vm1, %v789_v31 }
 0x35b   :  { %v822_v49 = vpop.trf.xlu1  ;;  %v790_v53 = vpop.trf.xlu0 }
 0x35c   :  { %918 = vst.msk [vmem:[%s1783_s3 + $0x98] sm:$0xff] %vm206_vm1, %v822_v49  ;;  %902 = vst.msk [vmem:[%s1783_s3 + $0x18] sm:$0xff] %vm206_vm1, %v790_v53 }
 0x35f   :  { %v823_v62 = vpop.trf.xlu1  ;;  %v791_v63 = vpop.trf.xlu0 }
 0x360   :  { %919 = vst.msk [vmem:[%s1783_s3 + $0xa0] sm:$0xff] %vm206_vm1, %v823_v62  ;;  %903 = vst.msk [vmem:[%s1783_s3 + $0x20] sm:$0xff] %vm206_vm1, %v791_v63 }
 0x363   :  { %v824_v61 = vpop.trf.xlu1  ;;  %v792_v0 = vpop.trf.xlu0 }
 0x364   :  { %920 = vst.msk [vmem:[%s1783_s3 + $0xa8] sm:$0xff] %vm206_vm1, %v824_v61  ;;  %904 = vst.msk [vmem:[%s1783_s3 + $0x28] sm:$0xff] %vm206_vm1, %v792_v0 }
 0x367   :  { %v825_v2 = vpop.trf.xlu1  ;;  %v793_v5 = vpop.trf.xlu0 }
 0x368   :  { %921 = vst.msk [vmem:[%s1783_s3 + $0xb0] sm:$0xff] %vm206_vm1, %v825_v2  ;;  %905 = vst.msk [vmem:[%s1783_s3 + $0x30] sm:$0xff] %vm206_vm1, %v793_v5 }
 0x36b   :  { %v826_v18 = vpop.trf.xlu1  ;;  %v794_v4 = vpop.trf.xlu0 }
 0x36c   :  { %922 = vst.msk [vmem:[%s1783_s3 + $0xb8] sm:$0xff] %vm206_vm1, %v826_v18  ;;  %906 = vst.msk [vmem:[%s1783_s3 + $0x38] sm:$0xff] %vm206_vm1, %v794_v4 }
 0x36f   :  { %v827_v6 = vpop.trf.xlu1  ;;  %v795_v20 = vpop.trf.xlu0 }
 0x370   :  { %923 = vst.msk [vmem:[%s1783_s3 + $0xc0] sm:$0xff] %vm206_vm1, %v827_v6  ;;  %907 = vst.msk [vmem:[%s1783_s3 + $0x40] sm:$0xff] %vm206_vm1, %v795_v20 }
 0x373   :  { %v828_v8 = vpop.trf.xlu1  ;;  %v796_v21 = vpop.trf.xlu0 }
 0x374   :  { %924 = vst.msk [vmem:[%s1783_s3 + $0xc8] sm:$0xff] %vm206_vm1, %v828_v8  ;;  %908 = vst.msk [vmem:[%s1783_s3 + $0x48] sm:$0xff] %vm206_vm1, %v796_v21 }
 0x377   :  { %v829_v26 = vpop.trf.xlu1  ;;  %v797_v22 = vpop.trf.xlu0 }
 0x378   :  { %925 = vst.msk [vmem:[%s1783_s3 + $0xd0] sm:$0xff] %vm206_vm1, %v829_v26  ;;  %909 = vst.msk [vmem:[%s1783_s3 + $0x50] sm:$0xff] %vm206_vm1, %v797_v22 }
 0x37b   :  { %v830_v44 = vpop.trf.xlu1  ;;  %v798_v23 = vpop.trf.xlu0 }
 0x37c   :  { %926 = vst.msk [vmem:[%s1783_s3 + $0xd8] sm:$0xff] %vm206_vm1, %v830_v44  ;;  %910 = vst.msk [vmem:[%s1783_s3 + $0x58] sm:$0xff] %vm206_vm1, %v798_v23 }
 0x37f   :  { %v831_v1 = vpop.trf.xlu1  ;;  %v799_v17 = vpop.trf.xlu0 }
 0x380   :  { %927 = vst.msk [vmem:[%s1783_s3 + $0xe0] sm:$0xff] %vm206_vm1, %v831_v1  ;;  %911 = vst.msk [vmem:[%s1783_s3 + $0x60] sm:$0xff] %vm206_vm1, %v799_v17 }
 0x383   :  { %v832_v3 = vpop.trf.xlu1  ;;  %v800_v19 = vpop.trf.xlu0 }
 0x384   :  { %928 = vst.msk [vmem:[%s1783_s3 + $0xe8] sm:$0xff] %vm206_vm1, %v832_v3  ;;  %912 = vst.msk [vmem:[%s1783_s3 + $0x68] sm:$0xff] %vm206_vm1, %v800_v19 }
 0x387   :  { %v833_v24 = vpop.trf.xlu1  ;;  %v801_v7 = vpop.trf.xlu0 }
 0x388   :  { %929 = vst.msk [vmem:[%s1783_s3 + $0xf0] sm:$0xff] %vm206_vm1, %v833_v24  ;;  %913 = vst.msk [vmem:[%s1783_s3 + $0x70] sm:$0xff] %vm206_vm1, %v801_v7 }
 0x38b   :  { %v834_v25 = vpop.trf.xlu1  ;;  %v802_v29 = vpop.trf.xlu0 }
 0x38c   :  { %930 = vst.msk [vmem:[%s1783_s3 + $0xf8] sm:$0xff] %vm206_vm1, %v834_v25  ;;  %914 = vst.msk [vmem:[%s1783_s3 + $0x78] sm:$0xff] %vm206_vm1, %v802_v29 }
 0x38f   :  { %v883_v9 = vpop.trf.xlu1  ;;  %v851_v27 = vpop.trf.xlu0 }
 0x390   :  { %947 = vst.msk [vmem:[%s1783_s3 + $0x180] sm:$0xff] %vm206_vm1, %v883_v9  ;;  %931 = vst.msk [vmem:[%s1783_s3 + $0x100] sm:$0xff] %vm206_vm1, %v851_v27 }
 0x393   :  { %v884_v55 = vpop.trf.xlu1  ;;  %v852_v11 = vpop.trf.xlu0 }
 0x394   :  { %948 = vst.msk [vmem:[%s1783_s3 + $0x188] sm:$0xff] %vm206_vm1, %v884_v55  ;;  %932 = vst.msk [vmem:[%s1783_s3 + $0x108] sm:$0xff] %vm206_vm1, %v852_v11 }
 0x397   :  { %v885_v30 = vpop.trf.xlu1  ;;  %v853_v33 = vpop.trf.xlu0 }
 0x398   :  { %949 = vst.msk [vmem:[%s1783_s3 + $0x190] sm:$0xff] %vm206_vm1, %v885_v30  ;;  %933 = vst.msk [vmem:[%s1783_s3 + $0x110] sm:$0xff] %vm206_vm1, %v853_v33 }
 0x39b   :  { %v886_v56 = vpop.trf.xlu1  ;;  %v854_v48 = vpop.trf.xlu0 }
 0x39c   :  { %950 = vst.msk [vmem:[%s1783_s3 + $0x198] sm:$0xff] %vm206_vm1, %v886_v56  ;;  %934 = vst.msk [vmem:[%s1783_s3 + $0x118] sm:$0xff] %vm206_vm1, %v854_v48 }
 0x39f   :  { %v887_v38 = vpop.trf.xlu1  ;;  %v855_v13 = vpop.trf.xlu0 }
 0x3a0   :  { %951 = vst.msk [vmem:[%s1783_s3 + $0x1a0] sm:$0xff] %vm206_vm1, %v887_v38  ;;  %935 = vst.msk [vmem:[%s1783_s3 + $0x120] sm:$0xff] %vm206_vm1, %v855_v13 }
 0x3a3   :  { %v888_v35 = vpop.trf.xlu1  ;;  %v856_v15 = vpop.trf.xlu0 }
 0x3a4   :  { %952 = vst.msk [vmem:[%s1783_s3 + $0x1a8] sm:$0xff] %vm206_vm1, %v888_v35  ;;  %936 = vst.msk [vmem:[%s1783_s3 + $0x128] sm:$0xff] %vm206_vm1, %v856_v15 }
 0x3a7   :  { %v889_v37 = vpop.trf.xlu1  ;;  %v857_v42 = vpop.trf.xlu0 }
 0x3a8   :  { %953 = vst.msk [vmem:[%s1783_s3 + $0x1b0] sm:$0xff] %vm206_vm1, %v889_v37  ;;  %937 = vst.msk [vmem:[%s1783_s3 + $0x130] sm:$0xff] %vm206_vm1, %v857_v42 }
 0x3ab   :  { %v890_v45 = vpop.trf.xlu1  ;;  %v858_v46 = vpop.trf.xlu0 }
 0x3ac   :  { %954 = vst.msk [vmem:[%s1783_s3 + $0x1b8] sm:$0xff] %vm206_vm1, %v890_v45  ;;  %938 = vst.msk [vmem:[%s1783_s3 + $0x138] sm:$0xff] %vm206_vm1, %v858_v46 }
 0x3af   :  { %v891_v39 = vpop.trf.xlu1  ;;  %v859_v32 = vpop.trf.xlu0 }
 0x3b0   :  { %955 = vst.msk [vmem:[%s1783_s3 + $0x1c0] sm:$0xff] %vm206_vm1, %v891_v39  ;;  %939 = vst.msk [vmem:[%s1783_s3 + $0x140] sm:$0xff] %vm206_vm1, %v859_v32 }
 0x3b3   :  { %v892_v50 = vpop.trf.xlu1  ;;  %v860_v43 = vpop.trf.xlu0 }
 0x3b4   :  { %956 = vst.msk [vmem:[%s1783_s3 + $0x1c8] sm:$0xff] %vm206_vm1, %v892_v50  ;;  %940 = vst.msk [vmem:[%s1783_s3 + $0x148] sm:$0xff] %vm206_vm1, %v860_v43 }
 0x3b7   :  { %v893_v51 = vpop.trf.xlu1  ;;  %v861_v57 = vpop.trf.xlu0 }
 0x3b8   :  { %957 = vst.msk [vmem:[%s1783_s3 + $0x1d0] sm:$0xff] %vm206_vm1, %v893_v51  ;;  %941 = vst.msk [vmem:[%s1783_s3 + $0x150] sm:$0xff] %vm206_vm1, %v861_v57 }
 0x3bb   :  { %v894_v58 = vpop.trf.xlu1  ;;  %v862_v59 = vpop.trf.xlu0 }
 0x3bc   :  { %958 = vst.msk [vmem:[%s1783_s3 + $0x1d8] sm:$0xff] %vm206_vm1, %v894_v58  ;;  %942 = vst.msk [vmem:[%s1783_s3 + $0x158] sm:$0xff] %vm206_vm1, %v862_v59 }
 0x3bf   :  { %v895_v10 = vpop.trf.xlu1  ;;  %v863_v28 = vpop.trf.xlu0 }
 0x3c0   :  { %959 = vst.msk [vmem:[%s1783_s3 + $0x1e0] sm:$0xff] %vm206_vm1, %v895_v10  ;;  %943 = vst.msk [vmem:[%s1783_s3 + $0x160] sm:$0xff] %vm206_vm1, %v863_v28 }
 0x3c3   :  { %v896_v60 = vpop.trf.xlu1  ;;  %v864_v41 = vpop.trf.xlu0 }
 0x3c4   :  { %960 = vst.msk [vmem:[%s1783_s3 + $0x1e8] sm:$0xff] %vm206_vm1, %v896_v60  ;;  %944 = vst.msk [vmem:[%s1783_s3 + $0x168] sm:$0xff] %vm206_vm1, %v864_v41 }
 0x3c7   :  { %v897_v12 = vpop.trf.xlu1  ;;  %v865_v34 = vpop.trf.xlu0 }
 0x3c8   :  { %961 = vst.msk [vmem:[%s1783_s3 + $0x1f0] sm:$0xff] %vm206_vm1, %v897_v12  ;;  %945 = vst.msk [vmem:[%s1783_s3 + $0x170] sm:$0xff] %vm206_vm1, %v865_v34 }
 0x3cb   :  { %v898_v47 = vpop.trf.xlu1  ;;  %v866_v52 = vpop.trf.xlu0 }
 0x3cc   :  { %962 = vst.msk [vmem:[%s1783_s3 + $0x1f8] sm:$0xff] %vm206_vm1, %v898_v47  ;;  %946 = vst.msk [vmem:[%s1783_s3 + $0x178] sm:$0xff] %vm206_vm1, %v866_v52 }

</bundles_post_ra>
